<compile_context>
chip_gen: v7x
topology: tpu7x:2x2x1
jax: 0.10.0
libtpu: 0.0.40
codegen_flags: <defaults>
</compile_context>

<pallas_src>
import functools

import jax
import jax.numpy as jnp
from jax.experimental import pallas as pl
from jax.experimental.pallas import tpu as pltpu


# ----------------------------------------------------------------------------
# Kernel
# ----------------------------------------------------------------------------
def _mlp_policy_kernel(x_ref, w1_ref, b1_ref, w2_ref, b2_ref, w3_ref, b3_ref,
                       o_ref):
    # Layer 1: bf16 MXU matmul with f32 accumulation, f32 bias add + tanh.
    h1 = jnp.tanh(
        jnp.dot(x_ref[...], w1_ref[...], preferred_element_type=jnp.float32)
        + b1_ref[...])
    # Layer 2: cast activation back to the weight dtype for the MXU, keep the
    # elementwise math (bias add, tanh) in f32 (v5e has no bf16 VPU/EUP).
    h2 = jnp.tanh(
        jnp.dot(h1.astype(w2_ref.dtype), w2_ref[...],
                preferred_element_type=jnp.float32)
        + b2_ref[...])
    # Output layer: Linear only (output_activation=None in BasicPolicy).
    # o_ref is lane-dense (last dim a multiple of 128) -> unmasked stores.
    o_ref[...] = (
        jnp.dot(h2.astype(w3_ref.dtype), w3_ref[...],
                preferred_element_type=jnp.float32)
        + b3_ref[...]).astype(o_ref.dtype)


# ----------------------------------------------------------------------------
# Wrapper
# ----------------------------------------------------------------------------
_LANE = 128
_SUBLANE = 8


def _round_up(n, m):
    return ((n + m - 1) // m) * m


def _pad2(a, rows, cols, dtype):
    out = jnp.zeros((rows, cols), dtype)
    return out.at[: a.shape[0], : a.shape[1]].set(a.astype(dtype))


@functools.partial(jax.jit, static_argnames=("tile_batch",))
def basic_policy_forward(x, params, *, tile_batch=256):
    """Fused MLP policy forward pass.

    x:      (batch, in_features) float32
    params: dict with w1 (in,h1), b1 (1,h1), w2 (h1,h2), b2 (1,h2),
            w3 (h2,action_dim), b3 (1,action_dim), all float32
    returns logits: (batch, action_dim) float32
    """
    batch, in_features = x.shape
    h1_dim = params["w1"].shape[1]
    h2_dim = params["w2"].shape[1]
    action_dim = params["w3"].shape[1]

    # Lane-dense padded sizes (multiples of 128 on every feature axis).
    in_p = _round_up(in_features, _LANE)
    h1_p = _round_up(h1_dim, _LANE)
    h2_p = _round_up(h2_dim, _LANE)
    out_p = _round_up(action_dim, _LANE)

    # --- Batch tile size: >= 8 (sublane), <= tile_batch, fits VMEM budget ---
    weight_bytes = 2 * (in_p * h1_p + h1_p * h2_p + h2_p * out_p)   # bf16
    bias_bytes = 4 * (h1_p + h2_p + out_p)                          # f32
    vmem_budget = 24 * 1024 * 1024  # conservative for v7x (32 MiB scoped)

    tb = min(tile_batch, _round_up(batch, _SUBLANE))
    tb = max(_SUBLANE, _round_up(tb, _SUBLANE))
    while tb > _SUBLANE:
        per_step = (
            2 * tb * in_p * 2        # double-buffered bf16 x tile
            + 2 * tb * out_p * 4     # double-buffered f32 output tile
            + 2 * (weight_bytes + bias_bytes)  # (double-buffered) params
            + 2 * tb * max(h1_p, h2_p) * 4     # f32 intermediates h1/h2
        )
        if per_step <= vmem_budget:
            break
        tb //= 2
        tb = _round_up(tb, _SUBLANE)

    batch_p = _round_up(batch, tb)
    grid = (batch_p // tb,)

    # --- Padded / casted operands (zero padding keeps the math exact:
    #     padded weight rows/cols and bias lanes are zero). ---
    x_p = _pad2(x, batch_p, in_p, jnp.bfloat16)
    w1_p = _pad2(params["w1"], in_p, h1_p, jnp.bfloat16)
    w2_p = _pad2(params["w2"], h1_p, h2_p, jnp.bfloat16)
    w3_p = _pad2(params["w3"], h2_p, out_p, jnp.bfloat16)
    b1_p = _pad2(params["b1"], 1, h1_p, jnp.float32)
    b2_p = _pad2(params["b2"], 1, h2_p, jnp.float32)
    b3_p = _pad2(params["b3"], 1, out_p, jnp.float32)

    cost = pl.CostEstimate(
        flops=2 * batch_p * (in_p * h1_p + h1_p * h2_p + h2_p * out_p),
        transcendentals=batch_p * (h1_p + h2_p),
        bytes_accessed=(x_p.size * 2 + weight_bytes + bias_bytes
                        + batch_p * out_p * 4),
    )

    out_padded = pl.pallas_call(
        _mlp_policy_kernel,
        out_shape=jax.ShapeDtypeStruct((batch_p, out_p), jnp.float32),
        grid_spec=pltpu.PrefetchScalarGridSpec(
            num_scalar_prefetch=0,
            grid=grid,
            in_specs=[
                # x: tiled along batch, feature axis lane-dense.
                pl.BlockSpec((tb, in_p), lambda i: (i, 0)),
                # Weights / biases: constant index map -> VMEM resident.
                pl.BlockSpec((in_p, h1_p), lambda i: (0, 0)),
                pl.BlockSpec((1, h1_p), lambda i: (0, 0)),
                pl.BlockSpec((h1_p, h2_p), lambda i: (0, 0)),
                pl.BlockSpec((1, h2_p), lambda i: (0, 0)),
                pl.BlockSpec((h2_p, out_p), lambda i: (0, 0)),
                pl.BlockSpec((1, out_p), lambda i: (0, 0)),
            ],
            out_specs=pl.BlockSpec((tb, out_p), lambda i: (i, 0)),
        ),
        compiler_params=pltpu.CompilerParams(
            dimension_semantics=("parallel",),   # megacore split on v7x
            vmem_limit_bytes=32 * 1024 * 1024,
        ),
        cost_estimate=cost,
    )(x_p, w1_p, b1_p, w2_p, b2_p, w3_p, b3_p)

    # Slice off batch padding and the zero-padded output lanes.
    return out_padded[:batch, :action_dim]


# ----------------------------------------------------------------------------
# Params + reference
# ----------------------------------------------------------------------------
def init_params(key, in_features, hidden_sizes, action_dim, use_bias=True):
    """Uniform fan-in weight init, zero biases (matches nn.init.zeros_ on
    biases in the reference module)."""
    sizes = [in_features] + list(hidden_sizes) + [action_dim]
    params = {}
    for i in range(len(sizes) - 1):
        key, wk = jax.random.split(key)
        fan_in, fan_out = sizes[i], sizes[i + 1]
        bound = 1.0 / jnp.sqrt(jnp.float32(fan_in))
        params[f"w{i + 1}"] = jax.random.uniform(
            wk, (fan_in, fan_out), jnp.float32, minval=-bound, maxval=bound)
        params[f"b{i + 1}"] = jnp.zeros((1, fan_out), jnp.float32)
    return params


def reference_forward(x, params):
    """Pure-JAX f32 reference for correctness checking."""
    h1 = jnp.tanh(x @ params["w1"] + params["b1"])
    h2 = jnp.tanh(h1 @ params["w2"] + params["b2"])
    return h2 @ params["w3"] + params["b3"]


# ----------------------------------------------------------------------------
# Test
# ----------------------------------------------------------------------------
if __name__ == "__main__":
    in_features = 32
    hidden_sizes = (64, 64)
    action_dim = 8

    key = jax.random.PRNGKey(0)
    key, pk = jax.random.split(key)
    params = init_params(pk, in_features, hidden_sizes, action_dim)

    # Small-batch check (single grid step).
    key, xk = jax.random.split(key)
    x_small = jax.random.normal(xk, (8, in_features), jnp.float32)
    y_small = jax.block_until_ready(basic_policy_forward(x_small, params))
    ref_small = reference_forward(x_small, params)
    assert y_small.shape == (8, action_dim)
    # bf16 MXU operands -> loosened tolerance vs. the f32 reference.
    assert jnp.allclose(y_small, ref_small, atol=2e-2, rtol=2e-2), \
        "small-batch mismatch vs reference"

    # Larger, non-multiple batch: exercises the batch grid + padding path.
    key, xk = jax.random.split(key)
    x_big = jax.random.normal(xk, (513, in_features), jnp.float32)
    y_big = jax.block_until_ready(basic_policy_forward(x_big, params))
    ref_big = reference_forward(x_big, params)
    assert y_big.shape == (513, action_dim)
    assert jnp.allclose(y_big, ref_big, atol=2e-2, rtol=2e-2), \
        "large-batch mismatch vs reference"

    print("KERNEL_OK")
</pallas_src>

<mosaic_0001>
module attributes {stable_mosaic.version = 11 : i64} {
  func.func @_mlp_policy_kernel(%arg0: i32, %arg1: memref<8x128xbf16, #tpu.memory_space<vmem>>, %arg2: memref<128x128xbf16, #tpu.memory_space<vmem>>, %arg3: memref<1x128xf32, #tpu.memory_space<vmem>>, %arg4: memref<128x128xbf16, #tpu.memory_space<vmem>>, %arg5: memref<1x128xf32, #tpu.memory_space<vmem>>, %arg6: memref<128x128xbf16, #tpu.memory_space<vmem>>, %arg7: memref<1x128xf32, #tpu.memory_space<vmem>>, %arg8: memref<8x128xf32, #tpu.memory_space<vmem>>) attributes {dimension_semantics = [#tpu.dimension_semantics<parallel>], iteration_bounds = array<i64: 1>, scalar_prefetch = 0 : i64, scratch_operands = 0 : i64, tpu.core_type = #tpu.core_type<tc>, window_params = [{transform_indices = @transform_0, window_bounds = array<i64: 8, 128>}, {pipeline_mode = #tpu.pipeline_mode<synchronous>, transform_indices = @transform_1, window_bounds = array<i64: 128, 128>}, {pipeline_mode = #tpu.pipeline_mode<synchronous>, transform_indices = @transform_2, window_bounds = array<i64: 1, 128>}, {pipeline_mode = #tpu.pipeline_mode<synchronous>, transform_indices = @transform_3, window_bounds = array<i64: 128, 128>}, {pipeline_mode = #tpu.pipeline_mode<synchronous>, transform_indices = @transform_4, window_bounds = array<i64: 1, 128>}, {pipeline_mode = #tpu.pipeline_mode<synchronous>, transform_indices = @transform_5, window_bounds = array<i64: 128, 128>}, {pipeline_mode = #tpu.pipeline_mode<synchronous>, transform_indices = @transform_6, window_bounds = array<i64: 1, 128>}, {transform_indices = @transform_7, window_bounds = array<i64: 8, 128>}]} {
    %c0 = arith.constant 0 : index
    %c0_0 = arith.constant 0 : index
    %0 = vector.load %arg1[%c0, %c0_0] : memref<8x128xbf16, #tpu.memory_space<vmem>>, vector<8x128xbf16>
    %c0_1 = arith.constant 0 : index
    %c0_2 = arith.constant 0 : index
    %1 = vector.load %arg2[%c0_1, %c0_2] : memref<128x128xbf16, #tpu.memory_space<vmem>>, vector<128x128xbf16>
    %cst = arith.constant dense<0.000000e+00> : vector<8x128xf32>
    %2 = tpu.matmul %0, %1, %cst {dimension_numbers = #tpu.dot_dimension_numbers<[1], [0], [0], [1], [0, 0, 1, 1], [], []>} : vector<8x128xbf16>, vector<128x128xbf16>, vector<8x128xf32> -> vector<8x128xf32>
    %c0_3 = arith.constant 0 : index
    %c0_4 = arith.constant 0 : index
    %3 = vector.load %arg3[%c0_3, %c0_4] : memref<1x128xf32, #tpu.memory_space<vmem>>, vector<1x128xf32>
    %4 = vector.broadcast %3 : vector<1x128xf32> to vector<8x128xf32>
    %5 = arith.addf %2, %4 : vector<8x128xf32>
    %6 = math.tanh %5 : vector<8x128xf32>
    %7 = arith.truncf %6 : vector<8x128xf32> to vector<8x128xbf16>
    %c0_5 = arith.constant 0 : index
    %c0_6 = arith.constant 0 : index
    %8 = vector.load %arg4[%c0_5, %c0_6] : memref<128x128xbf16, #tpu.memory_space<vmem>>, vector<128x128xbf16>
    %cst_7 = arith.constant dense<0.000000e+00> : vector<8x128xf32>
    %9 = tpu.matmul %7, %8, %cst_7 {dimension_numbers = #tpu.dot_dimension_numbers<[1], [0], [0], [1], [0, 0, 1, 1], [], []>} : vector<8x128xbf16>, vector<128x128xbf16>, vector<8x128xf32> -> vector<8x128xf32>
    %c0_8 = arith.constant 0 : index
    %c0_9 = arith.constant 0 : index
    %10 = vector.load %arg5[%c0_8, %c0_9] : memref<1x128xf32, #tpu.memory_space<vmem>>, vector<1x128xf32>
    %11 = vector.broadcast %10 : vector<1x128xf32> to vector<8x128xf32>
    %12 = arith.addf %9, %11 : vector<8x128xf32>
    %13 = math.tanh %12 : vector<8x128xf32>
    %14 = arith.truncf %13 : vector<8x128xf32> to vector<8x128xbf16>
    %c0_10 = arith.constant 0 : index
    %c0_11 = arith.constant 0 : index
    %15 = vector.load %arg6[%c0_10, %c0_11] : memref<128x128xbf16, #tpu.memory_space<vmem>>, vector<128x128xbf16>
    %cst_12 = arith.constant dense<0.000000e+00> : vector<8x128xf32>
    %16 = tpu.matmul %14, %15, %cst_12 {dimension_numbers = #tpu.dot_dimension_numbers<[1], [0], [0], [1], [0, 0, 1, 1], [], []>} : vector<8x128xbf16>, vector<128x128xbf16>, vector<8x128xf32> -> vector<8x128xf32>
    %c0_13 = arith.constant 0 : index
    %c0_14 = arith.constant 0 : index
    %17 = vector.load %arg7[%c0_13, %c0_14] : memref<1x128xf32, #tpu.memory_space<vmem>>, vector<1x128xf32>
    %18 = vector.broadcast %17 : vector<1x128xf32> to vector<8x128xf32>
    %19 = arith.addf %16, %18 : vector<8x128xf32>
    %c0_15 = arith.constant 0 : index
    %c0_16 = arith.constant 0 : index
    %20 = vector.load %arg8[%c0_15, %c0_16] : memref<8x128xf32, #tpu.memory_space<vmem>>, vector<8x128xf32>
    tpu.vector_store %arg8[%c0_15, %c0_16], %19 {strides = array<i32>} : memref<8x128xf32, #tpu.memory_space<vmem>>, vector<8x128xf32>,
    return
  }
  func.func @transform_0(%arg0: i32) -> (i32, i32) {
    %c0_i32 = arith.constant 0 : i32
    %c0_i32_0 = arith.constant 0 : i32
    return %arg0, %c0_i32 : i32, i32
  }
  func.func @transform_1(%arg0: i32) -> (i32, i32) {
    %c0_i32 = arith.constant 0 : i32
    %c0_i32_0 = arith.constant 0 : i32
    %c0_i32_1 = arith.constant 0 : i32
    return %c0_i32, %c0_i32_0 : i32, i32
  }
  func.func @transform_2(%arg0: i32) -> (i32, i32) {
    %c0_i32 = arith.constant 0 : i32
    %c0_i32_0 = arith.constant 0 : i32
    %c0_i32_1 = arith.constant 0 : i32
    return %c0_i32, %c0_i32_0 : i32, i32
  }
  func.func @transform_3(%arg0: i32) -> (i32, i32) {
    %c0_i32 = arith.constant 0 : i32
    %c0_i32_0 = arith.constant 0 : i32
    %c0_i32_1 = arith.constant 0 : i32
    return %c0_i32, %c0_i32_0 : i32, i32
  }
  func.func @transform_4(%arg0: i32) -> (i32, i32) {
    %c0_i32 = arith.constant 0 : i32
    %c0_i32_0 = arith.constant 0 : i32
    %c0_i32_1 = arith.constant 0 : i32
    return %c0_i32, %c0_i32_0 : i32, i32
  }
  func.func @transform_5(%arg0: i32) -> (i32, i32) {
    %c0_i32 = arith.constant 0 : i32
    %c0_i32_0 = arith.constant 0 : i32
    %c0_i32_1 = arith.constant 0 : i32
    return %c0_i32, %c0_i32_0 : i32, i32
  }
  func.func @transform_6(%arg0: i32) -> (i32, i32) {
    %c0_i32 = arith.constant 0 : i32
    %c0_i32_0 = arith.constant 0 : i32
    %c0_i32_1 = arith.constant 0 : i32
    return %c0_i32, %c0_i32_0 : i32, i32
  }
  func.func @transform_7(%arg0: i32) -> (i32, i32) {
    %c0_i32 = arith.constant 0 : i32
    %c0_i32_0 = arith.constant 0 : i32
    return %arg0, %c0_i32 : i32, i32
  }
}

</mosaic_0001>

<bundles_post_ra>
// kernel: basic_policy_forward.1
= control target key start
LH: loop header
LB: loop body
LE: loop exit
PB: predicated region body
PF: predicated region fallthrough
CT: control target
= control target key end

     0   :  { %v550_v1 = vmov 0.0   ;;  %vm551_vm0 = vmmov 0   ;;  %s719_s0 = inlined_call_operand.vmem [shape: bf16[8,128], index: 0, kind: input, shape index: {}]   ;;  %s720_s1 = inlined_call_operand.vmem [shape: bf16[128,128], index: 1, kind: input, shape index: {}]   ;;  %s721_s2 = inlined_call_operand.vmem [shape: f32[1,128], index: 2, kind: input, shape index: {}]   ;;  %s722_s3 = inlined_call_operand.vmem [shape: bf16[128,128], index: 3, kind: input, shape index: {}]   ;;  %s723_s4 = inlined_call_operand.vmem [shape: f32[1,128], index: 4, kind: input, shape index: {}]   ;;  %s724_s5 = inlined_call_operand.vmem [shape: bf16[128,128], index: 5, kind: input, shape index: {}]   ;;  %s725_s6 = inlined_call_operand.vmem [shape: f32[1,128], index: 6, kind: input, shape index: {}]   ;;  %s726_s7 = inlined_call_operand.hbm [shape: f32[8,128], index: 7, kind: output, shape index: {}]  }
   0x1   :  { %v498_v0 = vld [vmem:[%s720_s1] sm:$0xff]   ;;  %435 = vmatprep.subr.bf16.mxu0 %v550_v1  ;;  %455 = vmatprep.subr.bf16.mxu1 %v550_v1  ;;  %v499_v2 = vld [vmem:[%s720_s1 + $0x8] sm:$0xff]   ;;  %v500_v3 = vld [vmem:[%s720_s1 + $0x10] sm:$0xff]  }
   0x2   :  { %436 = vmatpush3.bf16.msra.mxu0 %v498_v0  ;;  %451 = vmatprep.mubr.msk.bf16.mxu0 %vm551_vm0, %v550_v1  ;;  %v506_v4 = vld [vmem:[%s722_s3] sm:$0xff]   ;;  %v501_v5 = vld [vmem:[%s720_s1 + $0x18] sm:$0xff]   ;;  %v507_v6 = vld [vmem:[%s722_s3 + $0x8] sm:$0xff]  }
   0x3   :  { %437 = vmatprep.subr.bf16.mxu0 %v550_v1  ;;  %471 = vmatprep.mubr.msk.bf16.mxu1 %vm551_vm0, %v550_v1  ;;  %v502_v7 = vld [vmem:[%s720_s1 + $0x20] sm:$0xff]   ;;  %v508_v8 = vld [vmem:[%s722_s3 + $0x10] sm:$0xff]   ;;  %v503_v9 = vld [vmem:[%s720_s1 + $0x28] sm:$0xff]  }
   0x4   :  { %456 = vmatpush3.bf16.msra.mxu1 %v506_v4  ;;  %v509_v10 = vld [vmem:[%s722_s3 + $0x18] sm:$0xff]  }
   0x5   :  { %457 = vmatprep.subr.bf16.mxu1 %v550_v1 }
   0x6   :  { %438 = vmatpush3.bf16.msra.mxu0 %v499_v2 }
   0x7   :  { %439 = vmatprep.subr.bf16.mxu0 %v550_v1 }
   0x8   :  { %458 = vmatpush3.bf16.msra.mxu1 %v507_v6 }
   0x9   :  { %459 = vmatprep.subr.bf16.mxu1 %v550_v1 }
   0xa   :  { %440 = vmatpush3.bf16.msra.mxu0 %v500_v3 }
   0xb   :  { %441 = vmatprep.subr.bf16.mxu0 %v550_v1 }
   0xc   :  { %460 = vmatpush3.bf16.msra.mxu1 %v508_v8 }
   0xd   :  { %461 = vmatprep.subr.bf16.mxu1 %v550_v1 }
   0xe   :  { %442 = vmatpush3.bf16.msra.mxu0 %v501_v5 }
   0xf   :  { %443 = vmatprep.subr.bf16.mxu0 %v550_v1 }
  0x12   :  { %444 = vmatpush3.bf16.msra.mxu0 %v502_v7 }
  0x13   :  { %445 = vmatprep.subr.bf16.mxu0 %v550_v1 }
  0x14   :  { %12 = vsyncpa [#allocation3], 0  ;;  %v504_v11 = vld [vmem:[%s720_s1 + $0x30] sm:$0xff]   ;;  %462 = vmatpush3.bf16.msra.mxu1 %v509_v10  ;;  %v505_v12 = vld [vmem:[%s720_s1 + $0x38] sm:$0xff]   ;;  %s552_s29 = smov [#allocation2]  }
  0x15   :  { %463 = vmatprep.subr.bf16.mxu1 %v550_v1  ;;  %v28_v13 = vld [vmem:[%s719_s0] sm:$0xf]  ;;  %v511_v15 = vld [vmem:[%s722_s3 + $0x28] sm:$0xff]   ;;  %v512_v16 = vld [vmem:[%s722_s3 + $0x30] sm:$0xff]  }
  0x16   :  { %446 = vmatpush3.bf16.msra.mxu0 %v503_v9  ;;  %v510_v14 = vld [vmem:[%s722_s3 + $0x20] sm:$0xff]   ;;  %v513_v17 = vld [vmem:[%s722_s3 + $0x38] sm:$0xff]   ;;  %v515_v19 = vld [vmem:[%s724_s5 + $0x8] sm:$0xff]  }
  0x17   :  { %447 = vmatprep.subr.bf16.mxu0 %v550_v1  ;;  %v514_v18 = vld [vmem:[%s724_s5] sm:$0xff]   ;;  %v516_v20 = vld [vmem:[%s724_s5 + $0x10] sm:$0xff]   ;;  %v517_v21 = vld [vmem:[%s724_s5 + $0x18] sm:$0xff]  }
  0x18   :  { %464 = vmatpush3.bf16.msra.mxu1 %v510_v14  ;;  %v381_v22 = vld [vmem:[%s721_s2] ss:$0 sm:$0xff]  ;;  %v519_v31 = vld [vmem:[%s724_s5 + $0x28] sm:$0xff]   ;;  %v520_v32 = vld [vmem:[%s724_s5 + $0x30] sm:$0xff]  }
  0x19   :  { %465 = vmatprep.subr.bf16.mxu1 %v550_v1  ;;  %v518_v30 = vld [vmem:[%s724_s5 + $0x20] sm:$0xff]   ;;  %v521_v33 = vld [vmem:[%s724_s5 + $0x38] sm:$0xff]   ;;  %s373_s5 = sshll.u32 %s552_s29, 4  ;;  %s374_s5 = int_to_ptr.vmem [resolvable:$true] %s373_s5 }
  0x1a   :  { %448 = vmatpush3.bf16.msra.mxu0 %v504_v11  ;;  %v390_v34 = vld [vmem:[%s723_s4] ss:$0 sm:$0xff]  ;;  %s526_s4 = scalar_lea.vmem %s374_s5, 128  ;;  %p531_p1 = scmp.lt.s32.totalorder %s374_s5, %s374_s5 }
  0x1b   :  { %449 = vmatprep.subr.bf16.mxu0 %v550_v1  ;;  %v399_v42 = vld [vmem:[%s725_s6] ss:$0 sm:$0xff]  ;;  %p527_p0 = scmp.ne.s32.totalorder %s374_s5, %s526_s4  ;;  %p532_p2 = scmp.lt.s32.totalorder %s526_s4, %s526_s4 }
  0x1c   :  { %466 = vmatpush3.bf16.msra.mxu1 %v511_v15 }
  0x1d   :  { %467 = vmatprep.subr.bf16.mxu1 %v550_v1  ;;  %p533_p3 = por %p532_p2, %p531_p1 }
  0x1e   :  { %450 = vmatpush3.bf16.msra.mxu0 %v505_v12 }
  0x1f   :  { %475 = vmatprep.subr.bf16.mxu0 %v550_v1  ;;  %p534_p4 = pnand %p533_p3, %p527_p0 }
  0x20   :  { %468 = vmatpush3.bf16.msra.mxu1 %v512_v16 }
  0x21   :  { %452 = vmatmul.mubr.bf16.vlgmr.msra.gmra.mrb[0].mxu0 %v28_v13  ;;  %469 = vmatprep.subr.bf16.mxu1 %v550_v1 }
  0x22   :  { %491 = vmatprep.mubr.msk.bf16.mxu0 %vm551_vm0, %v550_v1  ;;  %476 = vmatpush3.bf16.msra.mxu0 %v514_v18 }
  0x23   :  { %477 = vmatprep.subr.bf16.mxu0 %v550_v1 }
  0x24   :  { %470 = vmatpush3.bf16.msra.mxu1 %v513_v17 }
  0x26   :  { %478 = vmatpush3.bf16.msra.mxu0 %v515_v19 }
  0x27   :  { %479 = vmatprep.subr.bf16.mxu0 %v550_v1 }
  0x2a   :  { %480 = vmatpush3.bf16.msra.mxu0 %v516_v20 }
  0x2b   :  { %481 = vmatprep.subr.bf16.mxu0 %v550_v1 }
  0x2e   :  { %482 = vmatpush3.bf16.msra.mxu0 %v517_v21 }
  0x2f   :  { %483 = vmatprep.subr.bf16.mxu0 %v550_v1 }
  0x32   :  { %484 = vmatpush3.bf16.msra.mxu0 %v518_v30 }
  0x33   :  { %485 = vmatprep.subr.bf16.mxu0 %v550_v1 }
  0x36   :  { %486 = vmatpush3.bf16.msra.mxu0 %v519_v31 }
  0x37   :  { %487 = vmatprep.subr.bf16.mxu0 %v550_v1 }
  0x3a   :  { %488 = vmatpush3.bf16.msra.mxu0 %v520_v32 }
  0x3b   :  { %489 = vmatprep.subr.bf16.mxu0 %v550_v1 }
  0x3e   :  { %490 = vmatpush3.bf16.msra.mxu0 %v521_v33 }
  0xf4   :  { %v134_v23 = vpop.f32.mrb[0].mxu0 }
  0xf5   :  { %v135_v24 = vadd.f32 %v381_v22, %v134_v23  ;;  %v453_v25 = vpop.f32.mrb[1].mxu0 }
  0xf6   :  { %v137_v26 = vpop.f32.mrb[2].mxu0 }
  0xf7   :  { %522 = vtanh.f32 %v135_v24  ;;  %v454_v27 = vpop.f32.mrb[3].mxu0 }
 0x101   :  { %v523_v28 = vpop.eup %522 }
 0x102   :  { %v141_v29 = vpack.c.bf16 %v523_v28, %v523_v28 }
 0x104   :  { %472 = vmatmul.mubr.bf16.vlgmr.msra.gmra.mrb[0].mxu1 %v141_v29 }
 0x1d7   :  { %v247_v35 = vpop.f32.mrb[0].mxu1 }
 0x1d8   :  { %v248_v36 = vadd.f32 %v390_v34, %v247_v35  ;;  %v473_v37 = vpop.f32.mrb[1].mxu1 }
 0x1d9   :  { %v250_v38 = vpop.f32.mrb[2].mxu1 }
 0x1da   :  { %524 = vtanh.f32 %v248_v36  ;;  %v474_v39 = vpop.f32.mrb[3].mxu1 }
 0x1e4   :  { %v525_v40 = vpop.eup %524 }
 0x1e5   :  { %v254_v41 = vpack.c.bf16 %v525_v40, %v525_v40 }
 0x1e7   :  { %492 = vmatmul.mubr.bf16.vlgmr.msra.gmra.mrb[4].mxu0 %v254_v41 }
 0x2ba   :  { %v360_v43 = vpop.f32.mrb[4].mxu0 }
 0x2bb   :  { %v361_v44 = vadd.f32 %v399_v42, %v360_v43  ;;  %v493_v45 = vpop.f32.mrb[5].mxu0 }
 0x2bc   :  { %v363_v46 = vpop.f32.mrb[6].mxu0 }
 0x2bd   :  { %366 = vst [vmem:[#allocation2] sm:$0xff] %v361_v44  ;;  %v494_v47 = vpop.f32.mrb[7].mxu0 }
 0x2be   :  { %537 = shalt.err (!%p534_p4)
}
 0x2bf   :  { %s538_s6 = scalar_lea.hbm %s726_s7, 128 }
 0x2c0   :  { %p539_p5 = scmp.ne.s32.totalorder %s726_s7, %s538_s6  ;;  %p542_p6 = scmp.lt.u32.totalorder %s538_s6, %s726_s7 }
 0x2c2   :  { %p544_p7 = pnand %p542_p6, %p539_p5 }
 0x2c4   :  { %547 = shalt.err (!%p544_p7)
}
 0x2c5   :  { %376 = dma.vmem_to_hbm [thread:$0]  %s374_s5, 128, %s726_s7, [#allocation3]  }
 0x2c6   :  { %548 = dma.done.wait [#allocation3], 128  }
 0x2c7   :  { %549 = vsyncadd [#allocation3], 4294967168 }
 0x2c8   :  { %380 = vsyncpa [#allocation3], 1 }

</bundles_post_ra>
